<compile_context>
chip_gen: v7x
topology: tpu7x:2x2x1
jax: 0.10.0
libtpu: 0.0.40
codegen_flags: <defaults>
</compile_context>

<pallas_src>
import functools

import jax
import jax.numpy as jnp
from jax import lax
from jax.experimental import pallas as pl
from jax.experimental.pallas import tpu as pltpu

_LANES = 128


def _sublane_multiple(dtype) -> int:
    # f32 -> 8, bf16/f16 -> 16, int8/fp8 -> 32 (packed sublanes).
    itemsize = jnp.dtype(dtype).itemsize
    return max(8, 8 * (4 // max(itemsize, 1)))


def _round_up(x: int, mult: int) -> int:
    return ((x + mult - 1) // mult) * mult


def _circle_loss_kernel(
    sp_ref, sn_ref, lse_p_ref, lse_n_ref,
    m_p_ref, s_p_ref, m_n_ref, s_n_ref,
    *, margin: float, gamma: float,
    nb: int, gb_p: int, gb_n: int, rem_p: int, rem_n: int,
):
    c = pl.program_id(0)          # core / "parallel" axis
    i = pl.program_id(1)          # streaming / "arbitrary" reduction axis
    g = c * nb + i                # global block index of this grid step

    # ---- init per-lane running (max, sum-of-exp) accumulators ----
    @pl.when(i == 0)
    def _():
        m_p_ref[...] = jnp.full_like(m_p_ref, -jnp.inf)
        m_n_ref[...] = jnp.full_like(m_n_ref, -jnp.inf)
        s_p_ref[...] = jnp.zeros_like(s_p_ref)
        s_n_ref[...] = jnp.zeros_like(s_n_ref)

    # Compile-time folded constants.
    one_plus_m = 1.0 + margin
    dp_gamma = (1.0 - margin) * gamma     # delta_p * gamma
    dn_gamma = margin * gamma             # delta_n * gamma

    def _online_update(logit, m_ref, s_ref, guard):
        # logit: (br, 128) f32.  Fold rows into the (8,128) per-lane
        # accumulator: pure vreg-to-vreg VPU max/add, no XLU reduce here.
        br = logit.shape[0]
        x3 = logit.reshape(br // 8, 8, _LANES)
        blk_max = jnp.max(x3, axis=0)                         # (8,128)
        m_old = m_ref[...]
        m_new = jnp.maximum(m_old, blk_max)
        # guard: only the masked tail block can leave -inf lanes behind.
        m_safe = jnp.where(m_new == -jnp.inf, 0.0, m_new) if guard else m_new
        alpha = jnp.exp(m_old - m_safe)                       # exp(-inf)=0 first time
        p = jnp.exp(x3 - m_safe[None])                        # masked -> exp(-inf)=0
        s_ref[...] = alpha * s_ref[...] + jnp.sum(p, axis=0)
        m_ref[...] = m_new

    def _stream_update(x_ref, m_ref, s_ref, logit_fn, gb, rem):
        br = x_ref.shape[0]
        block_elems = br * _LANES

        def _make(masked):
            def body():
                x = x_ref[...].astype(jnp.float32)            # cast in-kernel
                logit = logit_fn(x)
                if masked:
                    row = lax.broadcasted_iota(jnp.int32, (br, _LANES), 0)
                    col = lax.broadcasted_iota(jnp.int32, (br, _LANES), 1)
                    valid = (row * _LANES + col) < rem        # rem is static
                    logit = jnp.where(valid, logit, -jnp.inf)
                _online_update(logit, m_ref, s_ref, guard=masked)
            return body

        if rem == block_elems:                        # stream is block-aligned
            pl.when(g < gb)(_make(False))
        else:
            if gb > 1:
                pl.when(g < gb - 1)(_make(False))     # steady state: no mask
            pl.when(g == gb - 1)(_make(True))         # statically-known tail
        # grid slots with g >= gb are skipped entirely (imbalanced streams).

    # ---- positive pairs:  logit_p = -ap * (sp - delta_p) * gamma ----
    _stream_update(
        sp_ref, m_p_ref, s_p_ref,
        lambda sp: jnp.maximum(one_plus_m - sp, 0.0) * (dp_gamma - sp * gamma),
        gb_p, rem_p)

    # ---- negative pairs:  logit_n = an * (sn - delta_n) * gamma ----
    _stream_update(
        sn_ref, m_n_ref, s_n_ref,
        lambda sn: jnp.maximum(sn + margin, 0.0) * (sn * gamma - dn_gamma),
        gb_n, rem_n)

    # ---- finalize: one cross-sublane/lane reduce per stream, per core ----
    @pl.when(i == nb - 1)
    def _():
        def _lse(m_ref, s_ref):
            m = m_ref[...]
            s = s_ref[...]
            mx = jnp.max(m, keepdims=True)                            # (1,1)
            mx_safe = jnp.where(mx == -jnp.inf, 0.0, mx)
            tot = jnp.sum(s * jnp.exp(m - mx_safe), keepdims=True)    # (1,1)
            return mx + jnp.log(tot)          # -inf if this core saw no data

        lse_p_ref[...] = _lse(m_p_ref, s_p_ref)
        lse_n_ref[...] = _lse(m_n_ref, s_n_ref)


def _plan(length: int, dtype, max_block_rows: int):
    """Choose (block_rows, num_blocks, padded_len, tail_valid_elems)."""
    mult = _sublane_multiple(dtype)
    rows = pl.cdiv(length, _LANES)
    max_br = max((max_block_rows // mult) * mult, mult)
    gb = pl.cdiv(rows, max_br)
    # Distribute rows evenly across blocks to minimize (often eliminate) pad.
    br = min(_round_up(pl.cdiv(rows, gb), mult), max_br)
    gb = pl.cdiv(rows, br)
    padded_len = gb * br * _LANES
    rem = length - (gb - 1) * br * _LANES     # valid elems in the tail block
    return br, gb, padded_len, rem


def circle_loss(sp: jax.Array, sn: jax.Array, m: float = 0.25,
                gamma: float = 80.0, *, max_block_rows: int = 4096,
                num_cores: int = 2) -> jax.Array:
    """Pallas implementation of CircleLoss.forward(sp, sn) -> scalar loss."""
    assert sp.ndim == 1 and sn.ndim == 1
    assert sp.shape[0] > 0 and sn.shape[0] > 0

    br_p, gb_p, pad_p, rem_p = _plan(sp.shape[0], sp.dtype, max_block_rows)
    br_n, gb_n, pad_n, rem_n = _plan(sn.shape[0], sn.dtype, max_block_rows)

    # Grid: leading "parallel" core axis (uses both TCs on v7x; serializes
    # harmlessly on 1-TC v5e/v6e), trailing "arbitrary" streaming axis.
    nb = pl.cdiv(max(gb_p, gb_n), num_cores)

    def _to_2d(x, padded_len):
        # Zero-copy reshape when already block-aligned; otherwise pad only this
        # stream up to its own block multiple and let allow_input_fusion keep
        # the pad out of a separate HBM pass.
        if padded_len != x.shape[0]:
            x = jnp.pad(x, (0, padded_len - x.shape[0]))
        return x.reshape(padded_len // _LANES, _LANES)

    sp2 = _to_2d(sp, pad_p)
    sn2 = _to_2d(sn, pad_n)

    kernel = functools.partial(
        _circle_loss_kernel,
        margin=float(m), gamma=float(gamma),
        nb=nb, gb_p=gb_p, gb_n=gb_n, rem_p=rem_p, rem_n=rem_n,
    )

    def _in_map(nb_, gb_):
        # Clamp past-the-end slots onto the last real block: no wasted DMA for
        # the (compute-skipped) padding slots of the shorter stream.
        return lambda c, i: (jnp.minimum(c * nb_ + i, gb_ - 1), 0)

    lse_p, lse_n = pl.pallas_call(
        kernel,
        out_shape=(jax.ShapeDtypeStruct((num_cores, 1, 1), jnp.float32),
                   jax.ShapeDtypeStruct((num_cores, 1, 1), jnp.float32)),
        grid_spec=pltpu.PrefetchScalarGridSpec(
            num_scalar_prefetch=0,
            grid=(num_cores, nb),
            in_specs=[
                pl.BlockSpec((br_p, _LANES), _in_map(nb, gb_p)),
                pl.BlockSpec((br_n, _LANES), _in_map(nb, gb_n)),
            ],
            out_specs=[
                pl.BlockSpec((None, 1, 1), lambda c, i: (c, 0, 0)),
                pl.BlockSpec((None, 1, 1), lambda c, i: (c, 0, 0)),
            ],
            scratch_shapes=[
                pltpu.VMEM((8, _LANES), jnp.float32),   # running max, positives
                pltpu.VMEM((8, _LANES), jnp.float32),   # running sum, positives
                pltpu.VMEM((8, _LANES), jnp.float32),   # running max, negatives
                pltpu.VMEM((8, _LANES), jnp.float32),   # running sum, negatives
            ],
        ),
        compiler_params=pltpu.CompilerParams(
            dimension_semantics=("parallel", "arbitrary"),
            vmem_limit_bytes=32 * 1024 * 1024,
            allow_input_fusion=[True, True],
        ),
    )(sp2, sn2)

    # Tiny epilogue: combine per-core partial logsumexps, then softplus.
    lse_p_tot = jax.scipy.special.logsumexp(lse_p.reshape(-1), axis=0)
    lse_n_tot = jax.scipy.special.logsumexp(lse_n.reshape(-1), axis=0)
    return jax.nn.softplus(lse_p_tot + lse_n_tot)


def circle_loss_ref(sp, sn, m=0.25, gamma=80.0):
    """Pure-JAX reference mirroring the PyTorch module."""
    sp = sp.astype(jnp.float32)
    sn = sn.astype(jnp.float32)
    ap = jnp.maximum(-sp + 1.0 + m, 0.0)
    an = jnp.maximum(sn + m, 0.0)
    logit_p = -ap * (sp - (1.0 - m)) * gamma
    logit_n = an * (sn - m) * gamma
    z = (jax.scipy.special.logsumexp(logit_n, axis=0)
         + jax.scipy.special.logsumexp(logit_p, axis=0))
    return jax.nn.softplus(z)


if __name__ == "__main__":
    # CircleLoss has no learned parameters; m and gamma are fixed hyperparams.
    M, GAMMA = 0.25, 80.0

    key = jax.random.PRNGKey(0)
    kp, kn = jax.random.split(key)
    # Similarity scores in [-1, 1]: 64 positive-pair, 128 negative-pair.
    sp = jax.random.uniform(kp, (64,), jnp.float32, minval=-1.0, maxval=1.0)
    sn = jax.random.uniform(kn, (128,), jnp.float32, minval=-1.0, maxval=1.0)
    loss = jax.block_until_ready(circle_loss(sp, sn, m=M, gamma=GAMMA))
    ref = circle_loss_ref(sp, sn, m=M, gamma=GAMMA)
    assert jnp.allclose(loss, ref, rtol=1e-5, atol=1e-3), (loss, ref)

    # Block-aligned case: zero-copy reshape fast path, several grid steps,
    # both core slots active, no masking anywhere.
    kp2, kn2 = jax.random.split(jax.random.PRNGKey(1))
    sp_al = jax.random.uniform(kp2, (8192,), jnp.float32, minval=-1.0, maxval=1.0)
    sn_al = jax.random.uniform(kn2, (4096,), jnp.float32, minval=-1.0, maxval=1.0)
    loss_al = jax.block_until_ready(
        circle_loss(sp_al, sn_al, m=M, gamma=GAMMA, max_block_rows=16))
    ref_al = circle_loss_ref(sp_al, sn_al, m=M, gamma=GAMMA)
    assert jnp.allclose(loss_al, ref_al, rtol=1e-5, atol=1e-3), (loss_al, ref_al)

    # Ragged, imbalanced case: tail-only masking, skipped padding slots,
    # clamped index maps; small blocks force multiple grid steps per core.
    kp3, kn3 = jax.random.split(jax.random.PRNGKey(2))
    sp_big = jax.random.uniform(kp3, (5000,), jnp.float32, minval=-1.0, maxval=1.0)
    sn_big = jax.random.uniform(kn3, (3000,), jnp.float32, minval=-1.0, maxval=1.0)
    loss_big = jax.block_until_ready(
        circle_loss(sp_big, sn_big, m=M, gamma=GAMMA, max_block_rows=8))
    ref_big = circle_loss_ref(sp_big, sn_big, m=M, gamma=GAMMA)
    assert jnp.allclose(loss_big, ref_big, rtol=1e-5, atol=1e-3), (loss_big, ref_big)

    # bf16 inputs: in-kernel upcast, (16,128)-packed input blocks.
    sp_bf = sp_big.astype(jnp.bfloat16)
    sn_bf = sn_big.astype(jnp.bfloat16)
    loss_bf = jax.block_until_ready(
        circle_loss(sp_bf, sn_bf, m=M, gamma=GAMMA, max_block_rows=32))
    ref_bf = circle_loss_ref(sp_bf, sn_bf, m=M, gamma=GAMMA)
    assert jnp.allclose(loss_bf, ref_bf, rtol=1e-5, atol=1e-3), (loss_bf, ref_bf)

    print("KERNEL_OK")
</pallas_src>

<mosaic_0001>
module attributes {stable_mosaic.version = 11 : i64} {
  func.func @_circle_loss_kernel(%arg0: i32, %arg1: i32, %arg2: memref<8x128xf32, #tpu.memory_space<vmem>>, %arg3: memref<8x128xf32, #tpu.memory_space<vmem>>, %arg4: memref<1x1x1xf32, #tpu.memory_space<vmem>>, %arg5: memref<1x1x1xf32, #tpu.memory_space<vmem>>, %arg6: memref<8x128xf32, #tpu.memory_space<vmem>>, %arg7: memref<8x128xf32, #tpu.memory_space<vmem>>, %arg8: memref<8x128xf32, #tpu.memory_space<vmem>>, %arg9: memref<8x128xf32, #tpu.memory_space<vmem>>) attributes {dimension_semantics = [#tpu.dimension_semantics<parallel>, #tpu.dimension_semantics<arbitrary>], iteration_bounds = array<i64: 2, 1>, scalar_prefetch = 0 : i64, scratch_operands = 4 : i64, tpu.core_type = #tpu.core_type<tc>, window_params = [{transform_indices = @transform_0, window_bounds = array<i64: 8, 128>}, {transform_indices = @transform_1, window_bounds = array<i64: 8, 128>}, {transform_indices = @transform_2, window_bounds = array<i64: 1, 1, 1>}, {transform_indices = @transform_3, window_bounds = array<i64: 1, 1, 1>}]} {
    %c1_i32 = arith.constant 1 : i32
    %0 = arith.muli %arg0, %c1_i32 : i32
    %1 = arith.addi %0, %arg1 : i32
    %c0_i32 = arith.constant 0 : i32
    %2 = arith.cmpi eq, %arg1, %c0_i32 : i32
    %3 = arith.extui %2 : i1 to i32
    %c0_i32_0 = arith.constant 0 : i32
    %4 = arith.cmpi ne, %3, %c0_i32_0 : i32
    scf.if %4 {
      %cst = arith.constant 0xFF800000 : f32
      %14 = vector.broadcast %cst : f32 to vector<8x128xf32>
      %c0 = arith.constant 0 : index
      %c0_7 = arith.constant 0 : index
      %15 = vector.load %arg6[%c0, %c0_7] : memref<8x128xf32, #tpu.memory_space<vmem>>, vector<8x128xf32>
      tpu.vector_store %arg6[%c0, %c0_7], %14 {strides = array<i32>} : memref<8x128xf32, #tpu.memory_space<vmem>>, vector<8x128xf32>,
      %cst_8 = arith.constant 0xFF800000 : f32
      %16 = vector.broadcast %cst_8 : f32 to vector<8x128xf32>
      %c0_9 = arith.constant 0 : index
      %c0_10 = arith.constant 0 : index
      %17 = vector.load %arg8[%c0_9, %c0_10] : memref<8x128xf32, #tpu.memory_space<vmem>>, vector<8x128xf32>
      tpu.vector_store %arg8[%c0_9, %c0_10], %16 {strides = array<i32>} : memref<8x128xf32, #tpu.memory_space<vmem>>, vector<8x128xf32>,
      %cst_11 = arith.constant 0.000000e+00 : f32
      %18 = vector.broadcast %cst_11 : f32 to vector<8x128xf32>
      %c0_12 = arith.constant 0 : index
      %c0_13 = arith.constant 0 : index
      %19 = vector.load %arg7[%c0_12, %c0_13] : memref<8x128xf32, #tpu.memory_space<vmem>>, vector<8x128xf32>
      tpu.vector_store %arg7[%c0_12, %c0_13], %18 {strides = array<i32>} : memref<8x128xf32, #tpu.memory_space<vmem>>, vector<8x128xf32>,
      %cst_14 = arith.constant 0.000000e+00 : f32
      %20 = vector.broadcast %cst_14 : f32 to vector<8x128xf32>
      %c0_15 = arith.constant 0 : index
      %c0_16 = arith.constant 0 : index
      %21 = vector.load %arg9[%c0_15, %c0_16] : memref<8x128xf32, #tpu.memory_space<vmem>>, vector<8x128xf32>
      tpu.vector_store %arg9[%c0_15, %c0_16], %20 {strides = array<i32>} : memref<8x128xf32, #tpu.memory_space<vmem>>, vector<8x128xf32>,
    } else {
    }
    %c0_i32_1 = arith.constant 0 : i32
    %5 = arith.cmpi eq, %1, %c0_i32_1 : i32
    %6 = arith.extui %5 : i1 to i32
    %c0_i32_2 = arith.constant 0 : i32
    %7 = arith.cmpi ne, %6, %c0_i32_2 : i32
    scf.if %7 {
      %c0 = arith.constant 0 : index
      %c0_7 = arith.constant 0 : index
      %14 = vector.load %arg2[%c0, %c0_7] : memref<8x128xf32, #tpu.memory_space<vmem>>, vector<8x128xf32>
      %cst = arith.constant 1.250000e+00 : f32
      %15 = vector.broadcast %cst : f32 to vector<8x128xf32>
      %16 = arith.subf %15, %14 : vector<8x128xf32>
      %cst_8 = arith.constant 0.000000e+00 : f32
      %17 = vector.broadcast %cst_8 : f32 to vector<8x128xf32>
      %18 = arith.maximumf %16, %17 : vector<8x128xf32>
      %cst_9 = arith.constant 8.000000e+01 : f32
      %19 = vector.broadcast %cst_9 : f32 to vector<8x128xf32>
      %20 = arith.mulf %14, %19 : vector<8x128xf32>
      %cst_10 = arith.constant 6.000000e+01 : f32
      %21 = vector.broadcast %cst_10 : f32 to vector<8x128xf32>
      %22 = arith.subf %21, %20 : vector<8x128xf32>
      %23 = arith.mulf %18, %22 : vector<8x128xf32>
      %24 = tpu.iota {dimensions = array<i32: 0>} : vector<8x128xi32>
      %25 = tpu.iota {dimensions = array<i32: 1>} : vector<8x128xi32>
      %c128_i32 = arith.constant 128 : i32
      %26 = vector.broadcast %c128_i32 : i32 to vector<8x128xi32>
      %27 = arith.muli %24, %26 : vector<8x128xi32>
      %28 = arith.addi %27, %25 : vector<8x128xi32>
      %c64_i32 = arith.constant 64 : i32
      %29 = vector.broadcast %c64_i32 : i32 to vector<8x128xi32>
      %30 = arith.cmpi slt, %28, %29 : vector<8x128xi32>
      %cst_11 = arith.constant 0xFF800000 : f32
      %31 = vector.broadcast %cst_11 : f32 to vector<8x128xf32>
      %32 = arith.select %30, %23, %31 : vector<8x128xi1>, vector<8x128xf32>
      %33 = vector.shape_cast %32 : vector<8x128xf32> to vector<1x8x128xf32>
      %cst_12 = arith.constant dense<0xFF800000> : vector<8x128xf32>
      %34 = vector.multi_reduction <maximumf>, %33, %cst_12 [0] : vector<1x8x128xf32> to vector<8x128xf32>
      %c0_13 = arith.constant 0 : index
      %c0_14 = arith.constant 0 : index
      %35 = vector.load %arg6[%c0_13, %c0_14] : memref<8x128xf32, #tpu.memory_space<vmem>>, vector<8x128xf32>
      %36 = arith.maximumf %35, %34 : vector<8x128xf32>
      %cst_15 = arith.constant 0xFF800000 : f32
      %37 = vector.broadcast %cst_15 : f32 to vector<8x128xf32>
      %38 = arith.cmpf oeq, %36, %37 : vector<8x128xf32>
      %cst_16 = arith.constant 0.000000e+00 : f32
      %39 = vector.broadcast %cst_16 : f32 to vector<8x128xf32>
      %40 = arith.select %38, %39, %36 : vector<8x128xi1>, vector<8x128xf32>
      %41 = arith.subf %35, %40 : vector<8x128xf32>
      %42 = math.exp %41 : vector<8x128xf32>
      %43 = vector.shape_cast %40 : vector<8x128xf32> to vector<1x8x128xf32>
      %44 = arith.subf %33, %43 : vector<1x8x128xf32>
      %45 = math.exp %44 : vector<1x8x128xf32>
      %c0_17 = arith.constant 0 : index
      %c0_18 = arith.constant 0 : index
      %46 = vector.load %arg7[%c0_17, %c0_18] : memref<8x128xf32, #tpu.memory_space<vmem>>, vector<8x128xf32>
      %47 = arith.mulf %42, %46 : vector<8x128xf32>
      %cst_19 = arith.constant dense<0.000000e+00> : vector<8x128xf32>
      %48 = vector.multi_reduction <add>, %45, %cst_19 [0] : vector<1x8x128xf32> to vector<8x128xf32>
      %49 = arith.addf %47, %48 : vector<8x128xf32>
      %c0_20 = arith.constant 0 : index
      %c0_21 = arith.constant 0 : index
      %50 = vector.load %arg7[%c0_20, %c0_21] : memref<8x128xf32, #tpu.memory_space<vmem>>, vector<8x128xf32>
      tpu.vector_store %arg7[%c0_20, %c0_21], %49 {strides = array<i32>} : memref<8x128xf32, #tpu.memory_space<vmem>>, vector<8x128xf32>,
      %c0_22 = arith.constant 0 : index
      %c0_23 = arith.constant 0 : index
      %51 = vector.load %arg6[%c0_22, %c0_23] : memref<8x128xf32, #tpu.memory_space<vmem>>, vector<8x128xf32>
      tpu.vector_store %arg6[%c0_22, %c0_23], %36 {strides = array<i32>} : memref<8x128xf32, #tpu.memory_space<vmem>>, vector<8x128xf32>,
    } else {
    }
    %c0_i32_3 = arith.constant 0 : i32
    %8 = arith.cmpi eq, %1, %c0_i32_3 : i32
    %9 = arith.extui %8 : i1 to i32
    %c0_i32_4 = arith.constant 0 : i32
    %10 = arith.cmpi ne, %9, %c0_i32_4 : i32
    scf.if %10 {
      %c0 = arith.constant 0 : index
      %c0_7 = arith.constant 0 : index
      %14 = vector.load %arg3[%c0, %c0_7] : memref<8x128xf32, #tpu.memory_space<vmem>>, vector<8x128xf32>
      %cst = arith.constant 2.500000e-01 : f32
      %15 = vector.broadcast %cst : f32 to vector<8x128xf32>
      %16 = arith.addf %14, %15 : vector<8x128xf32>
      %cst_8 = arith.constant 0.000000e+00 : f32
      %17 = vector.broadcast %cst_8 : f32 to vector<8x128xf32>
      %18 = arith.maximumf %16, %17 : vector<8x128xf32>
      %cst_9 = arith.constant 8.000000e+01 : f32
      %19 = vector.broadcast %cst_9 : f32 to vector<8x128xf32>
      %20 = arith.mulf %14, %19 : vector<8x128xf32>
      %cst_10 = arith.constant 2.000000e+01 : f32
      %21 = vector.broadcast %cst_10 : f32 to vector<8x128xf32>
      %22 = arith.subf %20, %21 : vector<8x128xf32>
      %23 = arith.mulf %18, %22 : vector<8x128xf32>
      %24 = tpu.iota {dimensions = array<i32: 0>} : vector<8x128xi32>
      %25 = tpu.iota {dimensions = array<i32: 1>} : vector<8x128xi32>
      %c128_i32 = arith.constant 128 : i32
      %26 = vector.broadcast %c128_i32 : i32 to vector<8x128xi32>
      %27 = arith.muli %24, %26 : vector<8x128xi32>
      %28 = arith.addi %27, %25 : vector<8x128xi32>
      %c128_i32_11 = arith.constant 128 : i32
      %29 = vector.broadcast %c128_i32_11 : i32 to vector<8x128xi32>
      %30 = arith.cmpi slt, %28, %29 : vector<8x128xi32>
      %cst_12 = arith.constant 0xFF800000 : f32
      %31 = vector.broadcast %cst_12 : f32 to vector<8x128xf32>
      %32 = arith.select %30, %23, %31 : vector<8x128xi1>, vector<8x128xf32>
      %33 = vector.shape_cast %32 : vector<8x128xf32> to vector<1x8x128xf32>
      %cst_13 = arith.constant dense<0xFF800000> : vector<8x128xf32>
      %34 = vector.multi_reduction <maximumf>, %33, %cst_13 [0] : vector<1x8x128xf32> to vector<8x128xf32>
      %c0_14 = arith.constant 0 : index
      %c0_15 = arith.constant 0 : index
      %35 = vector.load %arg8[%c0_14, %c0_15] : memref<8x128xf32, #tpu.memory_space<vmem>>, vector<8x128xf32>
      %36 = arith.maximumf %35, %34 : vector<8x128xf32>
      %cst_16 = arith.constant 0xFF800000 : f32
      %37 = vector.broadcast %cst_16 : f32 to vector<8x128xf32>
      %38 = arith.cmpf oeq, %36, %37 : vector<8x128xf32>
      %cst_17 = arith.constant 0.000000e+00 : f32
      %39 = vector.broadcast %cst_17 : f32 to vector<8x128xf32>
      %40 = arith.select %38, %39, %36 : vector<8x128xi1>, vector<8x128xf32>
      %41 = arith.subf %35, %40 : vector<8x128xf32>
      %42 = math.exp %41 : vector<8x128xf32>
      %43 = vector.shape_cast %40 : vector<8x128xf32> to vector<1x8x128xf32>
      %44 = arith.subf %33, %43 : vector<1x8x128xf32>
      %45 = math.exp %44 : vector<1x8x128xf32>
      %c0_18 = arith.constant 0 : index
      %c0_19 = arith.constant 0 : index
      %46 = vector.load %arg9[%c0_18, %c0_19] : memref<8x128xf32, #tpu.memory_space<vmem>>, vector<8x128xf32>
      %47 = arith.mulf %42, %46 : vector<8x128xf32>
      %cst_20 = arith.constant dense<0.000000e+00> : vector<8x128xf32>
      %48 = vector.multi_reduction <add>, %45, %cst_20 [0] : vector<1x8x128xf32> to vector<8x128xf32>
      %49 = arith.addf %47, %48 : vector<8x128xf32>
      %c0_21 = arith.constant 0 : index
      %c0_22 = arith.constant 0 : index
      %50 = vector.load %arg9[%c0_21, %c0_22] : memref<8x128xf32, #tpu.memory_space<vmem>>, vector<8x128xf32>
      tpu.vector_store %arg9[%c0_21, %c0_22], %49 {strides = array<i32>} : memref<8x128xf32, #tpu.memory_space<vmem>>, vector<8x128xf32>,
      %c0_23 = arith.constant 0 : index
      %c0_24 = arith.constant 0 : index
      %51 = vector.load %arg8[%c0_23, %c0_24] : memref<8x128xf32, #tpu.memory_space<vmem>>, vector<8x128xf32>
      tpu.vector_store %arg8[%c0_23, %c0_24], %36 {strides = array<i32>} : memref<8x128xf32, #tpu.memory_space<vmem>>, vector<8x128xf32>,
    } else {
    }
    %c0_i32_5 = arith.constant 0 : i32
    %11 = arith.cmpi eq, %arg1, %c0_i32_5 : i32
    %12 = arith.extui %11 : i1 to i32
    %c0_i32_6 = arith.constant 0 : i32
    %13 = arith.cmpi ne, %12, %c0_i32_6 : i32
    scf.if %13 {
      %c0 = arith.constant 0 : index
      %c0_7 = arith.constant 0 : index
      %14 = vector.load %arg6[%c0, %c0_7] : memref<8x128xf32, #tpu.memory_space<vmem>>, vector<8x128xf32>
      %c0_8 = arith.constant 0 : index
      %c0_9 = arith.constant 0 : index
      %15 = vector.load %arg7[%c0_8, %c0_9] : memref<8x128xf32, #tpu.memory_space<vmem>>, vector<8x128xf32>
      %16 = vector.shape_cast %14 : vector<8x128xf32> to vector<1x8x128xf32>
      %cst = arith.constant dense<0xFF800000> : vector<1xf32>
      %17 = vector.multi_reduction <maximumf>, %16, %cst [1, 2] : vector<1x8x128xf32> to vector<1xf32>
      %18 = vector.shape_cast %17 : vector<1xf32> to vector<1x1x1xf32>
      %19 = vector.extract %18[0, 0, 0] : f32 from vector<1x1x1xf32>
      %20 = vector.broadcast %19 : f32 to vector<1x1xf32>
      %cst_10 = arith.constant 0xFF800000 : f32
      %21 = vector.broadcast %cst_10 : f32 to vector<1x1xf32>
      %22 = arith.cmpf oeq, %20, %21 : vector<1x1xf32>
      %cst_11 = arith.constant 0.000000e+00 : f32
      %23 = vector.broadcast %cst_11 : f32 to vector<1x1xf32>
      %24 = arith.select %22, %23, %20 : vector<1x1xi1>, vector<1x1xf32>
      %25 = vector.broadcast %24 : vector<1x1xf32> to vector<8x128xf32>
      %26 = arith.subf %14, %25 : vector<8x128xf32>
      %27 = math.exp %26 : vector<8x128xf32>
      %28 = arith.mulf %15, %27 : vector<8x128xf32>
      %29 = vector.shape_cast %28 : vector<8x128xf32> to vector<1x8x128xf32>
      %cst_12 = arith.constant dense<0.000000e+00> : vector<1xf32>
      %30 = vector.multi_reduction <add>, %29, %cst_12 [1, 2] : vector<1x8x128xf32> to vector<1xf32>
      %31 = vector.shape_cast %30 : vector<1xf32> to vector<1x1x1xf32>
      %32 = vector.extract %31[0, 0, 0] : f32 from vector<1x1x1xf32>
      %33 = vector.broadcast %32 : f32 to vector<1x1xf32>
      %34 = math.log %33 : vector<1x1xf32>
      %35 = arith.addf %20, %34 : vector<1x1xf32>
      %c0_13 = arith.constant 0 : index
      %c0_14 = arith.constant 0 : index
      %c0_15 = arith.constant 0 : index
      %36 = vector.load %arg4[%c0_13, %c0_14, %c0_15] : memref<1x1x1xf32, #tpu.memory_space<vmem>>, vector<1x1x1xf32>
      %37 = vector.shape_cast %36 : vector<1x1x1xf32> to vector<1x1xf32>
      %38 = vector.shape_cast %35 : vector<1x1xf32> to vector<1x1x1xf32>
      tpu.vector_store %arg4[%c0_13, %c0_14, %c0_15], %38 {strides = array<i32>} : memref<1x1x1xf32, #tpu.memory_space<vmem>>, vector<1x1x1xf32>,
      %c0_16 = arith.constant 0 : index
      %c0_17 = arith.constant 0 : index
      %39 = vector.load %arg8[%c0_16, %c0_17] : memref<8x128xf32, #tpu.memory_space<vmem>>, vector<8x128xf32>
      %c0_18 = arith.constant 0 : index
      %c0_19 = arith.constant 0 : index
      %40 = vector.load %arg9[%c0_18, %c0_19] : memref<8x128xf32, #tpu.memory_space<vmem>>, vector<8x128xf32>
      %41 = vector.shape_cast %39 : vector<8x128xf32> to vector<1x8x128xf32>
      %cst_20 = arith.constant dense<0xFF800000> : vector<1xf32>
      %42 = vector.multi_reduction <maximumf>, %41, %cst_20 [1, 2] : vector<1x8x128xf32> to vector<1xf32>
      %43 = vector.shape_cast %42 : vector<1xf32> to vector<1x1x1xf32>
      %44 = vector.extract %43[0, 0, 0] : f32 from vector<1x1x1xf32>
      %45 = vector.broadcast %44 : f32 to vector<1x1xf32>
      %cst_21 = arith.constant 0xFF800000 : f32
      %46 = vector.broadcast %cst_21 : f32 to vector<1x1xf32>
      %47 = arith.cmpf oeq, %45, %46 : vector<1x1xf32>
      %cst_22 = arith.constant 0.000000e+00 : f32
      %48 = vector.broadcast %cst_22 : f32 to vector<1x1xf32>
      %49 = arith.select %47, %48, %45 : vector<1x1xi1>, vector<1x1xf32>
      %50 = vector.broadcast %49 : vector<1x1xf32> to vector<8x128xf32>
      %51 = arith.subf %39, %50 : vector<8x128xf32>
      %52 = math.exp %51 : vector<8x128xf32>
      %53 = arith.mulf %40, %52 : vector<8x128xf32>
      %54 = vector.shape_cast %53 : vector<8x128xf32> to vector<1x8x128xf32>
      %cst_23 = arith.constant dense<0.000000e+00> : vector<1xf32>
      %55 = vector.multi_reduction <add>, %54, %cst_23 [1, 2] : vector<1x8x128xf32> to vector<1xf32>
      %56 = vector.shape_cast %55 : vector<1xf32> to vector<1x1x1xf32>
      %57 = vector.extract %56[0, 0, 0] : f32 from vector<1x1x1xf32>
      %58 = vector.broadcast %57 : f32 to vector<1x1xf32>
      %59 = math.log %58 : vector<1x1xf32>
      %60 = arith.addf %45, %59 : vector<1x1xf32>
      %c0_24 = arith.constant 0 : index
      %c0_25 = arith.constant 0 : index
      %c0_26 = arith.constant 0 : index
      %61 = vector.load %arg5[%c0_24, %c0_25, %c0_26] : memref<1x1x1xf32, #tpu.memory_space<vmem>>, vector<1x1x1xf32>
      %62 = vector.shape_cast %61 : vector<1x1x1xf32> to vector<1x1xf32>
      %63 = vector.shape_cast %60 : vector<1x1xf32> to vector<1x1x1xf32>
      tpu.vector_store %arg5[%c0_24, %c0_25, %c0_26], %63 {strides = array<i32>} : memref<1x1x1xf32, #tpu.memory_space<vmem>>, vector<1x1x1xf32>,
    } else {
    }
    return
  }
  func.func @transform_0(%arg0: i32, %arg1: i32) -> (i32, i32) {
    %c1_i32 = arith.constant 1 : i32
    %0 = arith.muli %arg0, %c1_i32 : i32
    %1 = arith.addi %0, %arg1 : i32
    %c0_i32 = arith.constant 0 : i32
    %2 = arith.minsi %1, %c0_i32 : i32
    %c0_i32_0 = arith.constant 0 : i32
    %c0_i32_1 = arith.constant 0 : i32
    return %2, %c0_i32_0 : i32, i32
  }
  func.func @transform_1(%arg0: i32, %arg1: i32) -> (i32, i32) {
    %c1_i32 = arith.constant 1 : i32
    %0 = arith.muli %arg0, %c1_i32 : i32
    %1 = arith.addi %0, %arg1 : i32
    %c0_i32 = arith.constant 0 : i32
    %2 = arith.minsi %1, %c0_i32 : i32
    %c0_i32_0 = arith.constant 0 : i32
    %c0_i32_1 = arith.constant 0 : i32
    return %2, %c0_i32_0 : i32, i32
  }
  func.func @transform_2(%arg0: i32, %arg1: i32) -> (i32, i32, i32) {
    %c0_i32 = arith.constant 0 : i32
    %c0_i32_0 = arith.constant 0 : i32
    %c0_i32_1 = arith.constant 0 : i32
    return %arg0, %c0_i32, %c0_i32_0 : i32, i32, i32
  }
  func.func @transform_3(%arg0: i32, %arg1: i32) -> (i32, i32, i32) {
    %c0_i32 = arith.constant 0 : i32
    %c0_i32_0 = arith.constant 0 : i32
    %c0_i32_1 = arith.constant 0 : i32
    return %arg0, %c0_i32, %c0_i32_0 : i32, i32, i32
  }
}

</mosaic_0001>

<bundles_post_ra>
// kernel: tpu_custom_call.1
= control target key start
LH: loop header
LB: loop body
LE: loop exit
PB: predicated region body
PF: predicated region fallthrough
CT: control target
= control target key end

     0   :  { %9 = vsyncpa [#allocation7], 0  ;;  %s895_s0 = inlined_call_operand.hbm [shape: f32[8,128], index: 0, kind: input, shape index: {}]   ;;  %s896_s1 = inlined_call_operand.hbm [shape: f32[8,128], index: 1, kind: input, shape index: {}]   ;;  %s897_s2 = inlined_call_operand.vmem [shape: f32[2,1,1], index: 2, kind: output, shape index: {0}]   ;;  %s898_s3 = inlined_call_operand.vmem [shape: f32[2,1,1], index: 3, kind: output, shape index: {1}]  }
   0x1   :  { %11 = vsyncpa [#allocation7 + $0x1], 0 }
   0x2   :  { %12 = vsyncpa [#allocation9], 0 }
   0x3   :  { %14 = vsyncpa [#allocation9 + $0x1], 0  ;;  %s754_s12 = smov 0   ;;  %s756_s13 = smov 0  }
   0x4   :  { %s758_s14 = smov 0   ;;  %s760_s15 = smov 0  }
   0x5   :  { %s762_s16 = smov 0  }
   0x6 LB: > { %s516_s17 = sadd.s32 4294967295, %s728_s16   ;;  %s32_s18 = sadd.s32 1, %s724_s15  ;;  %s728_s16 = sphi %s762_s16, %s20_s16   ;;  %s724_s15 = sphi %s760_s15, %s909_s15   ;;  %s720_s14 = sphi %s758_s14, %s908_s14   ;;  %s716_s13 = sphi %s756_s13, %s885_s13   ;;  %s712_s12 = sphi %s754_s12, %s907_s12  }
   0x7   : > { %p34_p0 = scmp.ge.s32.totalorder %s32_s18, 2  ;;  %p709_p1 = scmp.ne.s32.totalorder %s716_s13, 0 }
   0x8   : > { %p53_p2 = scmp.eq.s32.totalorder %s728_s16, 0  ;;  %p58_p3 = scmp.ne.s32.totalorder %s716_s13, %s712_s12 }
   0x9   : > { %s911_s18 = smov (%p34_p0, %s32_s18), 0  ;;  %p59_p4 = scmp.eq.s32.totalorder %s516_s17, 0 }
   0xa   : > { %p54_p5 = por %p709_p1, %p53_p2  ;;  %p550_p7 = scmp.lt.s32.totalorder %s728_s16, 2 }
   0xb   : > { %p784_p6 = por %p59_p4, %p58_p3  ;;  %s730_s20 = smov [#allocation6]  }
   0xc   : > { %s180_s21 = sshll.u32 %s730_s20, 4  ;;  %p789_p8 = pnand %p550_p7, %p54_p5  ;;  %s181_s21 = int_to_ptr.vmem [resolvable:$true] %s180_s21 }
   0xd   : > { %s900_s19 = scalar_select %p784_p6, 1, 0 }
   0xe   : > { %s617_s25 = scalar_lea.hbm %s895_s0, 128  ;;  %p619_p12 = pneg %p789_p8 }
   0xf   : > { %p618_p11 = scmp.ne.s32.totalorder %s895_s0, %s617_s25  ;;  %p624_p1 = scmp.lt.u32.totalorder %s617_s25, %s617_s25 }
  0x10   : > { %p626_p2 = scmp.lt.u32.totalorder %s617_s25, %s895_s0 }
  0x11   : > { %p620_p13 = pnand %p619_p12, %p618_p11 }
  0x12   : > { %p627_p3 = por %p626_p2, %p624_p1 }
  0x13   : > { %p621_p0 = pneg %p620_p13 }
  0x15   : > { %p628_p4 = pnand %p627_p3, %p621_p0 }
  0x17   : > { %631 = shalt.err (!%p628_p4)
}
  0x18   : > { %s632_s30 = scalar_lea.vmem %s181_s21, 128  ;;  %s639_s4 = scalar_lea.vmem %s181_s21, 256 }
  0x19   : > { %p633_p5 = scmp.ne.s32.totalorder %s181_s21, %s632_s30  ;;  %p640_p10 = scmp.lt.s32.totalorder %s181_s21, %s181_s21 }
  0x1a   : > { %p641_p6 = scmp.lt.s32.totalorder %s639_s4, %s632_s30 }
  0x1b   : > { %p635_p7 = pnand %p633_p5, %p619_p12 }
  0x1c   : > { %p642_p11 = por %p641_p6, %p640_p10 }
  0x1d   : > { %p636_p9 = pneg %p635_p7 }
  0x1f   : > { %p643_p13 = pnand %p642_p11, %p636_p9 }
  0x21   : > { %646 = shalt.err (!%p643_p13)
}
  0x22   : > { %546 = dma.hbm_to_vmem [thread:$0]  (!%p789_p8), %s895_s0, 128, %s181_s21, [#allocation7]  }
  0x23   : > { %p902_p0 = scmp.lt.s32.totalorder %s728_s16, 3  ;;  %p903_p1 = scmp.ge.s32.totalorder %s728_s16, 1 }
  0x24   : > { %s731_s8 = smov [#allocation8]   ;;  %s647_s12 = scalar_lea.hbm %s896_s1, 128 }
  0x25   : > { %p821_p2 = pnand %p903_p1, %p902_p0  ;;  %s201_s9 = sshll.u32 %s731_s8, 4  ;;  %s202_s9 = int_to_ptr.vmem [resolvable:$true] %s201_s9 }
  0x26   : > { %p648_p6 = scmp.ne.s32.totalorder %s896_s1, %s647_s12  ;;  %p654_p3 = scmp.lt.u32.totalorder %s647_s12, %s647_s12 }
  0x27   : > { %s904_s7 = scalar_select %p821_p2, 1, 0 }
  0x28   : > { %p650_p9 = pnand %p648_p6, %p619_p12  ;;  %p656_p4 = scmp.lt.u32.totalorder %s647_s12, %s896_s1 }
  0x2a   : > { %p651_p10 = pneg %p650_p9  ;;  %p657_p5 = por %p656_p4, %p654_p3 }
  0x2c   : > { %p658_p7 = pnand %p657_p5, %p651_p10 }
  0x2e   : > { %661 = shalt.err (!%p658_p7)
}
  0x2f   : > { %s662_s24 = scalar_lea.vmem %s202_s9, 128  ;;  %s669_s25 = scalar_lea.vmem %s202_s9, 256 }
  0x30   : > { %p663_p11 = scmp.ne.s32.totalorder %s202_s9, %s662_s24  ;;  %p670_p1 = scmp.lt.s32.totalorder %s202_s9, %s202_s9 }
  0x31   : > { %p671_p2 = scmp.lt.s32.totalorder %s669_s25, %s662_s24 }
  0x32   : > { %p665_p13 = pnand %p663_p11, %p619_p12 }
  0x33   : > { %p672_p6 = por %p671_p2, %p670_p1 }
  0x34   : > { %p666_p0 = pneg %p665_p13 }
  0x36   : > { %p673_p9 = pnand %p672_p6, %p666_p0 }
  0x38   : > { %676 = shalt.err (!%p673_p9)
}
  0x39   : > { %549 = dma.hbm_to_vmem [thread:$0]  (!%p789_p8), %s896_s1, 128, %s202_s9, [#allocation9]  }
  0x3a   : > { %p905_p10 = scmp.ne.s32.totalorder %s904_s7, 0 }
  0x3b   : > { %s212_s28 = sand.u32 (!%p905_p10), 1, %s716_s13   ;;  %p906_p12 = scmp.ne.s32.totalorder (!%p905_p10), %s900_s19, 0 }
  0x3c   : > { %210 = sbr.rel (%p905_p10) target bundleno = 778 (0x30a), region = 28  ;;  %s525_s29 = sshll.u32 (!%p905_p10), %s212_s28, 3 }
  0x3d   : > { %s213_s30 = scalar_lea.sflag (!%p905_p10), [#allocation7], %s212_s28  ;;  %s216_s4 = scalar_lea.vmem (!%p905_p10), [#allocation6], %s525_s29 }
  0x43   : > { %702 = dma.done.wait (%p906_p12), %s213_s30, 128  }
  0x44   : > { %704 = vsyncadd (%p906_p12), %s213_s30, 4294967168  ;;  %s222_s22 = scalar_lea.sflag [#allocation9], %s212_s28  ;;  %s225_s5 = scalar_lea.vmem [#allocation8], %s525_s29 }
  0x45   : > { %706 = dma.done.wait (%p906_p12), %s222_s22, 128  }
  0x46   : > { %708 = vsyncadd (%p906_p12), %s222_s22, 4294967168  ;;  %p260_p8 = scmp.lt.s32.totalorder %s720_s14, 1  ;;  %v732_v0 = vmov -inf   ;;  %v733_v1 = vmov 0.0   ;;  %p527_p2 = scmp.ne.s32.totalorder %s720_s14, 0 }
  0x47   : > { %271 = vst [vmem:[#allocation2] sm:$0xff] %v732_v0  ;;  %272 = vst [vmem:[#allocation4] sm:$0xff] %v732_v0  ;;  %v279_v2 = vld [vmem:[%s216_s4] sm:$0xff] (!%p527_p2)  ;;  %v285_v3 = vlaneseq (!%p527_p2)  ;;  %v309_v6 = vld [vmem:[%s225_s5] sm:$0xff] (!%p527_p2) }
  0x48   : > { %273 = vst [vmem:[#allocation3] sm:$0xff] %v733_v1  ;;  %274 = vst [vmem:[#allocation5] sm:$0xff] %v733_v1  ;;  %s858_s6 = scalar_select %p260_p8, %s720_s14, 1 }
  0x49   : > { %278 = sbr.rel (%p527_p2) target bundleno = 107 (0x6b), region = 44  ;;  %v280_v4 = vsub.f32 (!%p527_p2), 1.25, %v279_v2  ;;  %v282_v5 = vmul.f32 (!%p527_p2), 80.0, %v279_v2  ;;  %v286_v7 = vshrl.u32 (!%p527_p2), %v285_v3, 7  ;;  %v288_v8 = vand.u32 (!%p527_p2), 127, %v285_v3 }
  0x4a   : > { %s262_s9 = scalar_lea.vmem %s897_s2, %s858_s6  ;;  %s265_s11 = scalar_lea.vmem %s898_s3, %s858_s6  ;;  %v310_v9 = vadd.f32 (!%p527_p2), 0.25, %v309_v6  ;;  %v312_v10 = vmul.f32 (!%p527_p2), 80.0, %v309_v6 }
  0x4b   : > { %v281_v11 = vmax.f32 (!%p527_p2), %v280_v4, 0.0  ;;  %v283_v12 = vsub.f32 (!%p527_p2), 60.0, %v282_v5  ;;  %v289_v13 = vmul.u32 (!%p527_p2), 128, %v286_v7 }
  0x4c   : > { %v311_v14 = vmax.f32 (!%p527_p2), %v310_v9, 0.0  ;;  %v528_v15 = vadd.f32 (!%p527_p2), -20.0, %v312_v10 }
  0x4d   : > { %v284_v16 = vmul.f32 (!%p527_p2), %v283_v12, %v281_v11  ;;  %v290_v17 = vadd.s32 (!%p527_p2), %v289_v13, %v288_v8 }
  0x4e   : > { %v314_v18 = vmul.f32 (!%p527_p2), %v528_v15, %v311_v14  ;;  %v293_v19 = vld [vmem:[#allocation2] sm:$0xff] (!%p527_p2)  ;;  %v317_v20 = vld [vmem:[#allocation4] sm:$0xff] (!%p527_p2) }
  0x4f   : > { %vm291_vm0 = vcmp.lt.s32.totalorder (!%p527_p2), %v290_v17, 64  ;;  %vm315_vm1 = vcmp.lt.s32.totalorder (!%p527_p2), %v290_v17, 128  ;;  %v303_v35 = vld [vmem:[#allocation3] sm:$0xff] (!%p527_p2)  ;;  %v327_v37 = vld [vmem:[#allocation5] sm:$0xff] (!%p527_p2) }
  0x50   : > { %v292_v21 = vsel %vm291_vm0, %v284_v16, -inf  ;;  %v316_v22 = vsel %vm315_vm1, %v314_v18, -inf }
  0x51   : > { %v294_v23 = vmax.f32 %v293_v19, %v292_v21  ;;  %v318_v24 = vmax.f32 %v317_v20, %v316_v22 }
  0x53   : > { %vm295_vm2 = vcmp.eq.f32.partialorder %v294_v23, -inf  ;;  %308 = vst [vmem:[#allocation2] sm:$0xff] %v294_v23  ;;  %vm319_vm3 = vcmp.eq.f32.partialorder %v318_v24, -inf  ;;  %332 = vst [vmem:[#allocation4] sm:$0xff] %v318_v24 }
  0x54   : > { %v296_v25 = vsel %vm295_vm2, 0.0, %v294_v23  ;;  %v320_v26 = vsel %vm319_vm3, 0.0, %v318_v24 }
  0x55   : > { %v297_v27 = vsub.f32 %v293_v19, %v296_v25  ;;  %v300_v28 = vsub.f32 %v292_v21, %v296_v25  ;;  %v321_v29 = vsub.f32 %v317_v20, %v320_v26  ;;  %v324_v30 = vsub.f32 %v316_v22, %v320_v26 }
  0x57   : > { %v298_v31 = vmul.f32 1.442695, %v297_v27  ;;  %v301_v32 = vmul.f32 1.442695, %v300_v28  ;;  %v322_v33 = vmul.f32 1.442695, %v321_v29 }
  0x58   : > { %v325_v34 = vmul.f32 1.442695, %v324_v30 }
  0x59   : > { %601 = vpow2.f32 %v298_v31 }
  0x5a   : > { %603 = vpow2.f32 %v301_v32 }
  0x5b   : > { %605 = vpow2.f32 %v322_v33 }
  0x5c   : > { %607 = vpow2.f32 %v325_v34 }
  0x63   : > { %v602_v36 = vpop.eup %601 }
  0x64   : > { %v604_v38 = vpop.eup %603  ;;  %v304_v39 = vmul.f32 %v602_v36, %v303_v35 }
  0x65   : > { %v606_v40 = vpop.eup %605 }
  0x66   : > { %v608_v41 = vpop.eup %607  ;;  %v306_v42 = vadd.f32 %v604_v38, %v304_v39  ;;  %v328_v43 = vmul.f32 %v606_v40, %v327_v37 }
  0x68   : > { %307 = vst [vmem:[#allocation3] sm:$0xff] %v306_v42  ;;  %v330_v44 = vadd.f32 %v608_v41, %v328_v43 }
  0x6a   : > { %331 = vst [vmem:[#allocation5] sm:$0xff] %v330_v44 }
  0x6b PF: > { %v336_v45 = vld [vmem:[#allocation2] sm:$0xff]  ;;  %v369_v46 = vld [vmem:[#allocation4] sm:$0xff]  ;;  %vm367_vm6 = vcmask 0  }
  0x6c   : > { %338 = vmax.xlane.f32.xlu0 %v336_v45  ;;  %371 = vmax.xlane.f32.xlu1 %v369_v46 }
  0x6f   : > { %v337_v58 = vld [vmem:[#allocation3] sm:$0xff] }
  0x71   : > { %v370_v19 = vld [vmem:[#allocation5] sm:$0xff] }
  0xf9   : > { %v339_v47 = vpop.xlane.xlu0 %338  ;;  %v372_v61 = vpop.xlane.xlu1 %371 }
  0xfa   : > { %v340_v48 = vrot.slane %v339_v47, 4  ;;  %v373_v62 = vrot.slane %v372_v61, 4 }
  0xfc   : > { %v341_v49 = vmax.f32 %v339_v47, %v340_v48  ;;  %v374_v63 = vmax.f32 %v372_v61, %v373_v62 }
  0xfe   : > { %v342_v50 = vrot.slane %v341_v49, 2  ;;  %v375_v0 = vrot.slane %v374_v63, 2 }
 0x100   : > { %v343_v51 = vmax.f32 %v341_v49, %v342_v50  ;;  %v376_v4 = vmax.f32 %v374_v63, %v375_v0 }
 0x102   : > { %v344_v52 = vrot.slane %v343_v51, 1  ;;  %v377_v7 = vrot.slane %v376_v4, 1 }
 0x104   : > { %v345_v53 = vmax.f32 %v343_v51, %v344_v52  ;;  %v378_v10 = vmax.f32 %v376_v4, %v377_v7 }
 0x106   : > { %531 = vpush %v345_v53 }
 0x137   : > { %s532_s14 = spop %531 }
 0x138   : > { %v347_v54 = vstv %s532_s14 }
 0x139   : > { %vm348_vm4 = vcmp.eq.f32.partialorder %v347_v54, -inf }
 0x13a   : > { %v349_v55 = vsel %vm348_vm4, 0.0, %v347_v54 }
 0x13b   : > { %v350_v56 = vsub.f32 %v336_v45, %v349_v55 }
 0x13d   : > { %v351_v57 = vmul.f32 1.442695, %v350_v56 }
 0x13f   : > { %609 = vpow2.f32 %v351_v57 }
 0x149   : > { %v610_v59 = vpop.eup %609 }
 0x14a   : > { %v353_v60 = vmul.f32 %v610_v59, %v337_v58 }
 0x14c   : > { %354 = vadd.xlane.f32.xlu0 %v353_v60 }
 0x1d9   : > { %v355_v1 = vpop.xlane.xlu0 %354 }
 0x1da   : > { %v356_v2 = vrot.slane %v355_v1, 4 }
 0x1dc   : > { %v357_v3 = vadd.f32 %v356_v2, %v355_v1 }
 0x1de   : > { %v358_v5 = vrot.slane %v357_v3, 2 }
 0x1e0   : > { %v359_v6 = vadd.f32 %v358_v5, %v357_v3 }
 0x1e2   : > { %v360_v8 = vrot.slane %v359_v6, 1 }
 0x1e4   : > { %v361_v9 = vadd.f32 %v360_v8, %v359_v6 }
 0x1e6   : > { %533 = vpush %v361_v9 }
 0x1e7   : > { %535 = vpush %v378_v10 }
 0x217   : > { %s534_s12 = spop %533 }
 0x218   : > { %v363_v11 = vstv %s534_s12  ;;  %s536_s17 = spop %535 }
 0x219   : > { %611 = vlog2.f32 %v363_v11  ;;  %v380_v12 = vstv %s536_s17 }
 0x21a   : > { %vm381_vm5 = vcmp.eq.f32.partialorder %v380_v12, -inf }
 0x21b   : > { %v382_v13 = vsel %vm381_vm5, 0.0, %v380_v12 }
 0x21c   : > { %v383_v14 = vsub.f32 %v369_v46, %v382_v13 }
 0x21e   : > { %v384_v15 = vmul.f32 1.442695, %v383_v14 }
 0x220   : > { %613 = vpow2.f32 %v384_v15 }
 0x223   : > { %v612_v16 = vpop.eup %611 }
 0x224   : > { %v365_v17 = vmul.f32 0.6931472, %v612_v16 }
 0x226   : > { %v366_v18 = vadd.f32 %v365_v17, %v347_v54 }
 0x228   : > { %368 = vst.msk [vmem:[%s262_s9] sm:$0x1] %vm367_vm6, %v366_v18 }
 0x22a   : > { %v614_v20 = vpop.eup %613 }
 0x22b   : > { %v386_v21 = vmul.f32 %v614_v20, %v370_v19 }
 0x22d   : > { %387 = vadd.xlane.f32.xlu1 %v386_v21 }
 0x2ba   : > { %v388_v22 = vpop.xlane.xlu1 %387 }
 0x2bb   : > { %v389_v23 = vrot.slane %v388_v22, 4 }
 0x2bd   : > { %v390_v24 = vadd.f32 %v389_v23, %v388_v22 }
 0x2bf   : > { %v391_v25 = vrot.slane %v390_v24, 2 }
 0x2c1   : > { %v392_v26 = vadd.f32 %v391_v25, %v390_v24 }
 0x2c3   : > { %v393_v27 = vrot.slane %v392_v26, 1 }
 0x2c5   : > { %v394_v28 = vadd.f32 %v393_v27, %v392_v26 }
 0x2c7   : > { %537 = vpush %v394_v28 }
 0x2f8   : > { %s538_s23 = spop %537 }
 0x2f9   : > { %v396_v29 = vstv %s538_s23 }
 0x2fa   : > { %615 = vlog2.f32 %v396_v29 }
 0x304   : > { %v616_v30 = vpop.eup %615 }
 0x305   : > { %v398_v31 = vmul.f32 0.6931472, %v616_v30 }
 0x307   : > { %v399_v32 = vadd.f32 %v398_v31, %v380_v12 }
 0x309   : > { %400 = vst.msk [vmem:[%s265_s11] sm:$0x1] %vm367_vm6, %v399_v32 }
 0x30a PF: > { %s20_s16 = sadd.s32 1, %s728_s16   ;;  %s907_s12 = smov %s716_s13 }
 0x30b   : > { %p17_p3 = scmp.ge.s32.totalorder %s20_s16, 4   ;;  %s885_s13 = smov 0  }
 0x30c   : > { %s908_s14 = smov %s724_s15  ;;  %s909_s15 = smov %s911_s18 }
 0x30d   :  { %19 = sbr.rel (!%p17_p3) target bundleno = 6 (0x6), region = 105 }
 0x314   :  { %430 = vsyncpa [#allocation7], 1 }
 0x315   :  { %432 = vsyncpa [#allocation7 + $0x1], 1 }
 0x316   :  { %433 = vsyncpa [#allocation9], 1 }
 0x317   :  { %435 = vsyncpa [#allocation9 + $0x1], 1 }

</bundles_post_ra>
